<compile_context>
chip_gen: v7x
topology: tpu7x:2x2x1
jax: 0.10.0
libtpu: 0.0.40
codegen_flags: <defaults>
</compile_context>

<pallas_src>
import functools

import numpy as np

import jax
import jax.numpy as jnp
from jax.experimental import pallas as pl
from jax.experimental.pallas import tpu as pltpu

# --- tiny version-skew shims (documented names first, legacy fallback) ------
_MemorySpace = getattr(pltpu, "MemorySpace", None) or getattr(pltpu, "TPUMemorySpace", None)
_CompilerParams = getattr(pltpu, "CompilerParams", None) or getattr(pltpu, "TPUCompilerParams", None)
_SMEM = _MemorySpace.SMEM


# ----------------------------------------------------------------------------
# helper copied verbatim from the PyTorch source (host-side, static shapes)
# ----------------------------------------------------------------------------
def find_min_padding(size, divisor, step=1):
    leftover, pad_size = min(
        (((size + pad) % divisor, pad) for pad in range(0, size, step)))
    return pad_size


# ----------------------------------------------------------------------------
# Fused Pallas kernel (one (batch, lane_tile) block per grid step)
# ----------------------------------------------------------------------------
def _freq_filter_kernel(xg_ref, tmask_ref, hrow_ref, w1_ref, b1_ref, w2_ref,
                        b2_ref, slope_ref, o_ref, rep_ref, *,
                        p, hw, window, feat, chunk, n_chunks, pad_h, k_rows, kt):
    """Shapes seen by the kernel (leading batch/tile dims squeezed):

    xg_ref    : (window, T+128)  height-grouped input rows, p//2 halo baked in
    tmask_ref : (p, T)           conv1 tap validity (function of lane % p)
    hrow_ref  : (fw, T) int32    (lane//p)*window + r   (fw = feat*window)
    w1_ref    : (fw, p)          conv1 weights, row = f*window + r
    b1_ref    : (fw, 1)          conv1 bias, packed the same way
    w2_ref    : (feat, fw)       conv2 weights [g, f*window + r]
    b2_ref    : (feat, 1)        conv2 bias
    slope_ref : (2,)  SMEM       PReLU slopes (a1, a2)
    o_ref     : (feat, T)        fused output (lane-dense 128-aligned stores)
    rep_ref   : (fw, chunk+128)  VMEM scratch for sublane replication
    """
    fw = feat * window
    chi = chunk + 128                       # chunk + one vreg column of halo
    a1 = slope_ref[0]
    a2 = slope_ref[1]

    # conv2-height window of *real* (non zero-padded) rows for this lane tile.
    # Tile offsets are p-aligned, so only these two scalars depend on the tile.
    lo = pad_h - pl.program_id(1) * (kt * window)
    hi = lo + k_rows

    def chunk_body(c, carry):
        off = pl.multiple_of(c * chunk, 128)

        # Replicate the `window` input rows across the `feat` sublane groups so
        # every VALU op below runs on full 8-sublane vregs.
        xch = xg_ref[:, pl.ds(off, chi)]                      # (window, chi)
        for f in range(feat):
            rep_ref[f * window:(f + 1) * window, :] = xch
        xr = rep_ref[...]                                     # (fw, chi)

        tmask = tmask_ref[:, pl.ds(off, chunk)]               # (p, chunk)  f32
        hrow = hrow_ref[:, pl.ds(off, chunk)]                 # (fw, chunk) i32

        # conv1: kernel (1, p), SAME padding *within* each length-p row.
        # Static lane shifts + per-tap validity mask; two independent
        # accumulators for VALU ILP.
        acc_a = None
        acc_b = None
        for t in range(p):
            s = t - hw
            term = w1_ref[:, t:t + 1] * (
                tmask[t:t + 1, :] * xr[:, hw + s:hw + s + chunk])
            if t % 2 == 0:
                acc_a = term if acc_a is None else acc_a + term
            else:
                acc_b = term if acc_b is None else acc_b + term
        y1 = acc_a if acc_b is None else acc_a + acc_b
        y1 = b1_ref[...] + y1
        y1 = jnp.where(y1 >= 0.0, y1, a1 * y1)                # PReLU 1
        # conv2's height zero-padding acts on the conv1 *output*: rows outside
        # the K real input rows must be exactly zero (load-bearing).
        y1 = jnp.where((hrow >= lo) & (hrow < hi), y1, 0.0)

        # conv2: kernel (window, 1), stride (window, 1) collapses to a pure
        # elementwise contraction over the fw packed (f, r) rows.
        out_a = None
        out_b = None
        for fr in range(fw):
            term = w2_ref[:, fr:fr + 1] * y1[fr:fr + 1, :]
            if fr % 2 == 0:
                out_a = term if out_a is None else out_a + term
            else:
                out_b = term if out_b is None else out_b + term
        y2 = out_a if out_b is None else out_a + out_b
        y2 = b2_ref[...] + y2
        o_ref[:, pl.ds(off, chunk)] = jnp.where(y2 >= 0.0, y2, a2 * y2)
        return carry

    jax.lax.fori_loop(0, n_chunks, chunk_body, 0, unroll=n_chunks <= 4)


# ----------------------------------------------------------------------------
# FreqFilter forward (wrapper: only input-sized pad/regroup glue stays in XLA)
# ----------------------------------------------------------------------------
def freq_filter_forward(params, seq, seq_len, min_sequence_len, lane_tile=None):
    """seq: (B, seq_len) float32 -> (B, features, min(min_sequence_len, n_out))."""
    p = params["p"]
    window = params["window"]
    feat = params["features"]
    hw = p // 2
    fw = feat * window
    assert p % 2 == 1
    assert 2 * hw <= 128, "TODO(synk): support p > 129 (halo wider than one vreg column)"

    seq = seq.astype(jnp.float32)
    B = seq.shape[0]
    pad_size = find_min_padding(seq_len, p)
    L = seq_len + pad_size
    K = L // p
    x = jnp.pad(seq, ((0, 0), (0, pad_size))).reshape(B, K, p)

    # conv2 geometry: kernel (window, 1), stride (window, 1), padding (p+140, 0)
    pad_h = p + 140
    Hp = K + 2 * pad_h
    out_h_full = (Hp - window) // window + 1
    n_out_full = out_h_full * p
    n_keep = min(min_sequence_len, n_out_full)      # lanes the module returns

    # Clamp compute to the conv2 output rows needed to cover n_keep lanes.
    out_h = min(out_h_full, -(-n_keep // p))
    n_lanes = out_h * p
    Hu = out_h * window

    # Height-pad and regroup rows by h % window (input-sized glue only; the
    # conv1 -> conv2 intermediate never touches HBM).
    bot = max(0, Hu - (pad_h + K))
    x_hp = jnp.pad(x, ((0, 0), (pad_h, bot), (0, 0)))[:, :Hu, :]
    xg = (x_hp.reshape(B, out_h, window, p)
              .transpose(0, 2, 1, 3)
              .reshape(B, window, n_lanes))

    # ---- lane-axis tiling (tile offsets stay p- and 128-aligned) -----------
    unit = 128 * p
    try:
        cap = getattr(pltpu.get_tpu_info(), "vmem_capacity_bytes",
                      64 * 1024 * 1024)
    except Exception:  # pragma: no cover - conservative fallback
        cap = 64 * 1024 * 1024
    if lane_tile is None:
        target = 16384 if cap <= 64 * 1024 * 1024 else 32768
        big = 512 * p                              # keeps a 512-lane inner chunk
        lane_tile = max(big, (target // big) * big)
    assert lane_tile % unit == 0, "lane_tile must be a multiple of 128*p"
    T = min(lane_tile, -(-n_lanes // unit) * unit)
    n_tiles = -(-n_lanes // T)
    lf = n_tiles * T
    T_in = T + 128                                 # p//2 halo, padded to 128
    chunk = 128
    for c in range(512, 127, -128):                # largest 128-mult <= 512 | T
        if T % c == 0:
            chunk = c
            break
    n_chunks = T // chunk

    # Per-tile input slabs with the halo baked in (overlap of 2*hw lanes).
    total = (n_tiles - 1) * T + T_in
    xg_p = jnp.pad(xg, ((0, 0), (0, 0), (hw, total - hw - n_lanes)))
    xg_t = jnp.stack([xg_p[:, :, t * T:t * T + T_in] for t in range(n_tiles)],
                     axis=1)                       # (B, n_tiles, window, T_in)

    # Small per-tile-local tables (identical for every tile because tile
    # offsets are multiples of p): conv1 tap validity and conv2 row ids.
    l = np.arange(T)
    jmod = l % p
    tap_mask = np.stack(
        [((jmod + (t - hw) >= 0) & (jmod + (t - hw) < p)) for t in range(p)]
    ).astype(np.float32)                           # (p, T)
    hrow = (((l // p) * window)[None, :]
            + (np.arange(fw) % window)[:, None]).astype(np.int32)   # (fw, T)

    # Weights packed to the (f*window + r) sublane order used in the kernel.
    w1p = jnp.repeat(params["w1"].astype(jnp.float32), window, axis=0)    # (fw, p)
    b1p = jnp.repeat(params["b1"].astype(jnp.float32), window)[:, None]   # (fw, 1)
    w2p = params["w2"].astype(jnp.float32).reshape(feat, fw)              # (feat, fw)
    b2c = params["b2"].astype(jnp.float32)[:, None]                       # (feat, 1)
    slopes = jnp.stack([jnp.asarray(params["a1"], jnp.float32),
                        jnp.asarray(params["a2"], jnp.float32)])

    kernel = functools.partial(
        _freq_filter_kernel, p=p, hw=hw, window=window, feat=feat,
        chunk=chunk, n_chunks=n_chunks, pad_h=pad_h, k_rows=K, kt=T // p)

    flops = 2 * B * lf * (fw * p + feat * fw)
    bytes_accessed = 4 * (B * n_tiles * window * T_in + B * feat * lf
                          + (p + fw) * T + fw * p + fw + feat * fw + feat + 2)

    out = pl.pallas_call(
        kernel,
        out_shape=jax.ShapeDtypeStruct((B, feat, lf), jnp.float32),
        grid=(B, n_tiles),
        in_specs=[
            pl.BlockSpec((None, None, window, T_in), lambda b, t: (b, t, 0, 0)),
            pl.BlockSpec((p, T), lambda b, t: (0, 0)),       # tap mask (resident)
            pl.BlockSpec((fw, T), lambda b, t: (0, 0)),      # row ids  (resident)
            pl.BlockSpec((fw, p), lambda b, t: (0, 0)),      # w1 packed
            pl.BlockSpec((fw, 1), lambda b, t: (0, 0)),      # b1 packed
            pl.BlockSpec((feat, fw), lambda b, t: (0, 0)),   # w2 packed
            pl.BlockSpec((feat, 1), lambda b, t: (0, 0)),    # b2
            pl.BlockSpec(memory_space=_SMEM),                # PReLU slopes
        ],
        out_specs=pl.BlockSpec((None, feat, T), lambda b, t: (b, 0, t)),
        scratch_shapes=[pltpu.VMEM((fw, chunk + 128), jnp.float32)],
        compiler_params=_CompilerParams(
            dimension_semantics=("parallel", "parallel"),
            vmem_limit_bytes=int(min(cap * 3 // 4, 96 * 1024 * 1024))),
        cost_estimate=pl.CostEstimate(flops=int(flops), transcendentals=0,
                                      bytes_accessed=int(bytes_accessed)),
    )(xg_t, jnp.asarray(tap_mask), jnp.asarray(hrow), w1p, b1p, w2p, b2c, slopes)

    # TODO(synk): for features >= 32 switch conv2 to an MXU matmul over the
    # packed (feat*window, chunk) stack; optionally carry xg as bf16 on v5e.
    return out[:, :, :n_keep]


# ----------------------------------------------------------------------------
# Pure-JAX reference (lax.conv) used only to validate the Pallas path.
# ----------------------------------------------------------------------------
def reference_forward(params, seq, seq_len, min_sequence_len):
    p = params["p"]
    window = params["window"]
    F_ = params["features"]
    pad_size = find_min_padding(seq_len, p)
    L = seq_len + pad_size
    seq = jnp.pad(seq, ((0, 0), (0, pad_size)))
    x = seq.reshape(-1, 1, L // p, p)

    w1 = params["w1"].reshape(F_, 1, 1, p)
    y = jax.lax.conv_general_dilated(
        x, w1, window_strides=(1, 1), padding=[(0, 0), (p // 2, p // 2)],
        dimension_numbers=("NCHW", "OIHW", "NCHW"))
    y = y + params["b1"].reshape(1, F_, 1, 1)
    y = jnp.where(y >= 0, y, params["a1"] * y)

    w2 = params["w2"].reshape(F_, F_, window, 1)
    y = jax.lax.conv_general_dilated(
        y, w2, window_strides=(window, 1),
        padding=[(p + 140, p + 140), (0, 0)],
        dimension_numbers=("NCHW", "OIHW", "NCHW"))
    y = y + params["b2"].reshape(1, F_, 1, 1)
    y = jnp.where(y >= 0, y, params["a2"] * y)

    b, f, k, pp = y.shape
    y = y.reshape(-1, F_, k * pp)
    return y[:, :, :min_sequence_len]


# ----------------------------------------------------------------------------
def init_params(key, period, window, features):
    p = period + 1 if period % 2 == 0 else period
    k1, k2, k3, k4 = jax.random.split(key, 4)
    return {
        "p": p,
        "window": window,
        "features": features,
        # Conv2d(1, F, (1, p)) weight (F,1,1,p) -> (F, p); bias (F,)
        "w1": 0.3 * jax.random.normal(k1, (features, p), jnp.float32),
        "b1": 0.1 * jax.random.normal(k2, (features,), jnp.float32),
        # Conv2d(F, F, (window, 1)) weight (F,F,window,1) -> (F,F,window); bias (F,)
        "w2": 0.3 * jax.random.normal(k3, (features, features, window), jnp.float32),
        "b2": 0.1 * jax.random.normal(k4, (features,), jnp.float32),
        # nn.PReLU() default single-parameter init
        "a1": jnp.float32(0.25),
        "a2": jnp.float32(0.25),
    }


if __name__ == "__main__":
    period = 4           # even -> module bumps it to p = 5
    window = 2
    features = 4
    batch = 2
    seq_len = 1200
    min_sequence_len = 1500   # > n_out: exercises the output-length clamp

    key = jax.random.PRNGKey(0)
    pkey, xkey = jax.random.split(key)
    params = init_params(pkey, period, window, features)
    seq = jax.random.normal(xkey, (batch, seq_len), jnp.float32)

    ref = jax.block_until_ready(
        reference_forward(params, seq, seq_len, min_sequence_len))

    # Small explicit lane tile: exercises the multi-tile grid, halo slabs and
    # the multi-chunk inner loop against the lax.conv reference.
    out = jax.block_until_ready(
        freq_filter_forward(params, seq, seq_len, min_sequence_len,
                            lane_tile=1280))
    assert out.shape == ref.shape, (out.shape, ref.shape)
    assert jnp.allclose(out, ref, atol=1e-4, rtol=1e-4), (
        float(jnp.max(jnp.abs(out - ref))))

    # Default per-chip lane tile.
    out2 = jax.block_until_ready(
        freq_filter_forward(params, seq, seq_len, min_sequence_len))
    assert out2.shape == ref.shape, (out2.shape, ref.shape)
    assert jnp.allclose(out2, ref, atol=1e-4, rtol=1e-4), (
        float(jnp.max(jnp.abs(out2 - ref))))

    print("KERNEL_OK")
</pallas_src>

<mosaic_0001>
module attributes {stable_mosaic.version = 11 : i64} {
  func.func @_freq_filter_kernel(%arg0: i32, %arg1: i32, %arg2: memref<1x1x2x1408xf32, #tpu.memory_space<vmem>>, %arg3: memref<5x1280xf32, #tpu.memory_space<vmem>>, %arg4: memref<8x1280xi32, #tpu.memory_space<vmem>>, %arg5: memref<8x5xf32, #tpu.memory_space<vmem>>, %arg6: memref<8x1xf32, #tpu.memory_space<vmem>>, %arg7: memref<4x8xf32, #tpu.memory_space<vmem>>, %arg8: memref<4x1xf32, #tpu.memory_space<vmem>>, %arg9: memref<2xf32, #tpu.memory_space<smem>>, %arg10: memref<1x4x1280xf32, #tpu.memory_space<vmem>>, %arg11: memref<8x384xf32, #tpu.memory_space<vmem>>) attributes {dimension_semantics = [#tpu.dimension_semantics<parallel>, #tpu.dimension_semantics<parallel>], iteration_bounds = array<i64: 2, 2>, scalar_prefetch = 0 : i64, scratch_operands = 1 : i64, tpu.core_type = #tpu.core_type<tc>, window_params = [{transform_indices = @transform_0, window_bounds = array<i64: 1, 1, 2, 1408>}, {pipeline_mode = #tpu.pipeline_mode<synchronous>, transform_indices = @transform_1, window_bounds = array<i64: 5, 1280>}, {pipeline_mode = #tpu.pipeline_mode<synchronous>, transform_indices = @transform_2, window_bounds = array<i64: 8, 1280>}, {pipeline_mode = #tpu.pipeline_mode<synchronous>, transform_indices = @transform_3, window_bounds = array<i64: 8, 5>}, {pipeline_mode = #tpu.pipeline_mode<synchronous>, transform_indices = @transform_4, window_bounds = array<i64: 8, 1>}, {pipeline_mode = #tpu.pipeline_mode<synchronous>, transform_indices = @transform_5, window_bounds = array<i64: 4, 8>}, {pipeline_mode = #tpu.pipeline_mode<synchronous>, transform_indices = @transform_6, window_bounds = array<i64: 4, 1>}, {transform_indices = @transform_7, window_bounds = array<i64: 2>}, {transform_indices = @transform_8, window_bounds = array<i64: 1, 4, 1280>}]} {
    %c0 = arith.constant 0 : index
    %0 = memref.load %arg9[%c0] : memref<2xf32, #tpu.memory_space<smem>>
    %c1 = arith.constant 1 : index
    %1 = memref.load %arg9[%c1] : memref<2xf32, #tpu.memory_space<smem>>
    %c512_i32 = arith.constant 512 : i32
    %2 = arith.muli %arg1, %c512_i32 : i32
    %c145_i32 = arith.constant 145 : i32
    %3 = arith.subi %c145_i32, %2 : i32
    %c240_i32 = arith.constant 240 : i32
    %4 = arith.addi %3, %c240_i32 : i32
    %c0_i32 = arith.constant 0 : i32
    %c5_i32 = arith.constant 5 : i32
    %5 = arith.addi %c0_i32, %c5_i32 : i32
    %c1_i32 = arith.constant 1 : i32
    scf.for %arg12 = %c0_i32 to %5 step %c1_i32  : i32 {
      %c256_i32 = arith.constant 256 : i32
      %6 = arith.muli %arg12, %c256_i32 : i32
      %7 = tpu.assume_multiple %6, 128 : i32
      %c0_1 = arith.constant 0 : index
      %c0_2 = arith.constant 0 : index
      %c0_3 = arith.constant 0 : index
      %8 = arith.index_cast %7 : i32 to index
      %9 = vector.load %arg2[%c0_1, %c0_2, %c0_3, %8] : memref<1x1x2x1408xf32, #tpu.memory_space<vmem>>, vector<1x1x2x384xf32>
      %10 = vector.shape_cast %9 : vector<1x1x2x384xf32> to vector<2x384xf32>
      %c0_4 = arith.constant 0 : index
      %c0_5 = arith.constant 0 : index
      %11 = vector.load %arg11[%c0_4, %c0_5] : memref<8x384xf32, #tpu.memory_space<vmem>>, vector<2x384xf32>
      tpu.vector_store %arg11[%c0_4, %c0_5], %10 {strides = array<i32>} : memref<8x384xf32, #tpu.memory_space<vmem>>, vector<2x384xf32>,
      %c2 = arith.constant 2 : index
      %c0_6 = arith.constant 0 : index
      %12 = vector.load %arg11[%c2, %c0_6] : memref<8x384xf32, #tpu.memory_space<vmem>>, vector<2x384xf32>
      tpu.vector_store %arg11[%c2, %c0_6], %10 {strides = array<i32>} : memref<8x384xf32, #tpu.memory_space<vmem>>, vector<2x384xf32>,
      %c4 = arith.constant 4 : index
      %c0_7 = arith.constant 0 : index
      %13 = vector.load %arg11[%c4, %c0_7] : memref<8x384xf32, #tpu.memory_space<vmem>>, vector<2x384xf32>
      tpu.vector_store %arg11[%c4, %c0_7], %10 {strides = array<i32>} : memref<8x384xf32, #tpu.memory_space<vmem>>, vector<2x384xf32>,
      %c6 = arith.constant 6 : index
      %c0_8 = arith.constant 0 : index
      %14 = vector.load %arg11[%c6, %c0_8] : memref<8x384xf32, #tpu.memory_space<vmem>>, vector<2x384xf32>
      tpu.vector_store %arg11[%c6, %c0_8], %10 {strides = array<i32>} : memref<8x384xf32, #tpu.memory_space<vmem>>, vector<2x384xf32>,
      %c0_9 = arith.constant 0 : index
      %c0_10 = arith.constant 0 : index
      %15 = vector.load %arg11[%c0_9, %c0_10] : memref<8x384xf32, #tpu.memory_space<vmem>>, vector<8x384xf32>
      %c0_11 = arith.constant 0 : index
      %16 = arith.index_cast %7 : i32 to index
      %17 = vector.load %arg3[%c0_11, %16] : memref<5x1280xf32, #tpu.memory_space<vmem>>, vector<5x256xf32>
      %c0_12 = arith.constant 0 : index
      %18 = arith.index_cast %7 : i32 to index
      %19 = vector.load %arg4[%c0_12, %18] : memref<8x1280xi32, #tpu.memory_space<vmem>>, vector<8x256xi32>
      %c0_13 = arith.constant 0 : index
      %c0_14 = arith.constant 0 : index
      %20 = vector.load %arg5[%c0_13, %c0_14] : memref<8x5xf32, #tpu.memory_space<vmem>>, vector<8x1xf32>
      %21 = vector.extract_strided_slice %17 {offsets = [0, 0], sizes = [1, 256], strides = [1, 1]} : vector<5x256xf32> to vector<1x256xf32>
      %22 = vector.extract_strided_slice %15 {offsets = [0, 0], sizes = [8, 256], strides = [1, 1]} : vector<8x384xf32> to vector<8x256xf32>
      %23 = vector.broadcast %21 : vector<1x256xf32> to vector<8x256xf32>
      %24 = arith.mulf %23, %22 : vector<8x256xf32>
      %25 = vector.broadcast %20 : vector<8x1xf32> to vector<8x256xf32>
      %26 = arith.mulf %25, %24 : vector<8x256xf32>
      %c0_15 = arith.constant 0 : index
      %c1_16 = arith.constant 1 : index
      %27 = vector.load %arg5[%c0_15, %c1_16] : memref<8x5xf32, #tpu.memory_space<vmem>>, vector<8x1xf32>
      %28 = vector.extract_strided_slice %17 {offsets = [1, 0], sizes = [1, 256], strides = [1, 1]} : vector<5x256xf32> to vector<1x256xf32>
      %29 = vector.extract_strided_slice %15 {offsets = [0, 1], sizes = [8, 256], strides = [1, 1]} : vector<8x384xf32> to vector<8x256xf32>
      %30 = vector.broadcast %28 : vector<1x256xf32> to vector<8x256xf32>
      %31 = arith.mulf %30, %29 : vector<8x256xf32>
      %32 = vector.broadcast %27 : vector<8x1xf32> to vector<8x256xf32>
      %33 = arith.mulf %32, %31 : vector<8x256xf32>
      %c0_17 = arith.constant 0 : index
      %c2_18 = arith.constant 2 : index
      %34 = vector.load %arg5[%c0_17, %c2_18] : memref<8x5xf32, #tpu.memory_space<vmem>>, vector<8x1xf32>
      %35 = vector.extract_strided_slice %17 {offsets = [2, 0], sizes = [1, 256], strides = [1, 1]} : vector<5x256xf32> to vector<1x256xf32>
      %36 = vector.extract_strided_slice %15 {offsets = [0, 2], sizes = [8, 256], strides = [1, 1]} : vector<8x384xf32> to vector<8x256xf32>
      %37 = vector.broadcast %35 : vector<1x256xf32> to vector<8x256xf32>
      %38 = arith.mulf %37, %36 : vector<8x256xf32>
      %39 = vector.broadcast %34 : vector<8x1xf32> to vector<8x256xf32>
      %40 = arith.mulf %39, %38 : vector<8x256xf32>
      %41 = arith.addf %26, %40 : vector<8x256xf32>
      %c0_19 = arith.constant 0 : index
      %c3 = arith.constant 3 : index
      %42 = vector.load %arg5[%c0_19, %c3] : memref<8x5xf32, #tpu.memory_space<vmem>>, vector<8x1xf32>
      %43 = vector.extract_strided_slice %17 {offsets = [3, 0], sizes = [1, 256], strides = [1, 1]} : vector<5x256xf32> to vector<1x256xf32>
      %44 = vector.extract_strided_slice %15 {offsets = [0, 3], sizes = [8, 256], strides = [1, 1]} : vector<8x384xf32> to vector<8x256xf32>
      %45 = vector.broadcast %43 : vector<1x256xf32> to vector<8x256xf32>
      %46 = arith.mulf %45, %44 : vector<8x256xf32>
      %47 = vector.broadcast %42 : vector<8x1xf32> to vector<8x256xf32>
      %48 = arith.mulf %47, %46 : vector<8x256xf32>
      %49 = arith.addf %33, %48 : vector<8x256xf32>
      %c0_20 = arith.constant 0 : index
      %c4_21 = arith.constant 4 : index
      %50 = vector.load %arg5[%c0_20, %c4_21] : memref<8x5xf32, #tpu.memory_space<vmem>>, vector<8x1xf32>
      %51 = vector.extract_strided_slice %17 {offsets = [4, 0], sizes = [1, 256], strides = [1, 1]} : vector<5x256xf32> to vector<1x256xf32>
      %52 = vector.extract_strided_slice %15 {offsets = [0, 4], sizes = [8, 256], strides = [1, 1]} : vector<8x384xf32> to vector<8x256xf32>
      %53 = vector.broadcast %51 : vector<1x256xf32> to vector<8x256xf32>
      %54 = arith.mulf %53, %52 : vector<8x256xf32>
      %55 = vector.broadcast %50 : vector<8x1xf32> to vector<8x256xf32>
      %56 = arith.mulf %55, %54 : vector<8x256xf32>
      %57 = arith.addf %41, %56 : vector<8x256xf32>
      %58 = arith.addf %57, %49 : vector<8x256xf32>
      %c0_22 = arith.constant 0 : index
      %c0_23 = arith.constant 0 : index
      %59 = vector.load %arg6[%c0_22, %c0_23] : memref<8x1xf32, #tpu.memory_space<vmem>>, vector<8x1xf32>
      %60 = vector.broadcast %59 : vector<8x1xf32> to vector<8x256xf32>
      %61 = arith.addf %60, %58 : vector<8x256xf32>
      %cst = arith.constant 0.000000e+00 : f32
      %62 = vector.broadcast %cst : f32 to vector<8x256xf32>
      %63 = arith.cmpf oge, %61, %62 : vector<8x256xf32>
      %64 = vector.broadcast %0 : f32 to vector<8x256xf32>
      %65 = arith.mulf %64, %61 : vector<8x256xf32>
      %66 = arith.select %63, %61, %65 : vector<8x256xi1>, vector<8x256xf32>
      %67 = vector.broadcast %3 : i32 to vector<8x256xi32>
      %68 = arith.cmpi sge, %19, %67 : vector<8x256xi32>
      %69 = vector.broadcast %4 : i32 to vector<8x256xi32>
      %70 = arith.cmpi slt, %19, %69 : vector<8x256xi32>
      %71 = arith.andi %68, %70 : vector<8x256xi1>
      %cst_24 = arith.constant 0.000000e+00 : f32
      %72 = vector.broadcast %cst_24 : f32 to vector<8x256xf32>
      %73 = arith.select %71, %66, %72 : vector<8x256xi1>, vector<8x256xf32>
      %c0_25 = arith.constant 0 : index
      %c0_26 = arith.constant 0 : index
      %74 = vector.load %arg7[%c0_25, %c0_26] : memref<4x8xf32, #tpu.memory_space<vmem>>, vector<4x1xf32>
      %75 = vector.extract_strided_slice %73 {offsets = [0, 0], sizes = [1, 256], strides = [1, 1]} : vector<8x256xf32> to vector<1x256xf32>
      %76 = vector.broadcast %74 : vector<4x1xf32> to vector<4x256xf32>
      %77 = vector.broadcast %75 : vector<1x256xf32> to vector<4x256xf32>
      %78 = arith.mulf %76, %77 : vector<4x256xf32>
      %c0_27 = arith.constant 0 : index
      %c1_28 = arith.constant 1 : index
      %79 = vector.load %arg7[%c0_27, %c1_28] : memref<4x8xf32, #tpu.memory_space<vmem>>, vector<4x1xf32>
      %80 = vector.extract_strided_slice %73 {offsets = [1, 0], sizes = [1, 256], strides = [1, 1]} : vector<8x256xf32> to vector<1x256xf32>
      %81 = vector.broadcast %79 : vector<4x1xf32> to vector<4x256xf32>
      %82 = vector.broadcast %80 : vector<1x256xf32> to vector<4x256xf32>
      %83 = arith.mulf %81, %82 : vector<4x256xf32>
      %c0_29 = arith.constant 0 : index
      %c2_30 = arith.constant 2 : index
      %84 = vector.load %arg7[%c0_29, %c2_30] : memref<4x8xf32, #tpu.memory_space<vmem>>, vector<4x1xf32>
      %85 = vector.extract_strided_slice %73 {offsets = [2, 0], sizes = [1, 256], strides = [1, 1]} : vector<8x256xf32> to vector<1x256xf32>
      %86 = vector.broadcast %84 : vector<4x1xf32> to vector<4x256xf32>
      %87 = vector.broadcast %85 : vector<1x256xf32> to vector<4x256xf32>
      %88 = arith.mulf %86, %87 : vector<4x256xf32>
      %89 = arith.addf %78, %88 : vector<4x256xf32>
      %c0_31 = arith.constant 0 : index
      %c3_32 = arith.constant 3 : index
      %90 = vector.load %arg7[%c0_31, %c3_32] : memref<4x8xf32, #tpu.memory_space<vmem>>, vector<4x1xf32>
      %91 = vector.extract_strided_slice %73 {offsets = [3, 0], sizes = [1, 256], strides = [1, 1]} : vector<8x256xf32> to vector<1x256xf32>
      %92 = vector.broadcast %90 : vector<4x1xf32> to vector<4x256xf32>
      %93 = vector.broadcast %91 : vector<1x256xf32> to vector<4x256xf32>
      %94 = arith.mulf %92, %93 : vector<4x256xf32>
      %95 = arith.addf %83, %94 : vector<4x256xf32>
      %c0_33 = arith.constant 0 : index
      %c4_34 = arith.constant 4 : index
      %96 = vector.load %arg7[%c0_33, %c4_34] : memref<4x8xf32, #tpu.memory_space<vmem>>, vector<4x1xf32>
      %97 = vector.extract_strided_slice %73 {offsets = [4, 0], sizes = [1, 256], strides = [1, 1]} : vector<8x256xf32> to vector<1x256xf32>
      %98 = vector.broadcast %96 : vector<4x1xf32> to vector<4x256xf32>
      %99 = vector.broadcast %97 : vector<1x256xf32> to vector<4x256xf32>
      %100 = arith.mulf %98, %99 : vector<4x256xf32>
      %101 = arith.addf %89, %100 : vector<4x256xf32>
      %c0_35 = arith.constant 0 : index
      %c5 = arith.constant 5 : index
      %102 = vector.load %arg7[%c0_35, %c5] : memref<4x8xf32, #tpu.memory_space<vmem>>, vector<4x1xf32>
      %103 = vector.extract_strided_slice %73 {offsets = [5, 0], sizes = [1, 256], strides = [1, 1]} : vector<8x256xf32> to vector<1x256xf32>
      %104 = vector.broadcast %102 : vector<4x1xf32> to vector<4x256xf32>
      %105 = vector.broadcast %103 : vector<1x256xf32> to vector<4x256xf32>
      %106 = arith.mulf %104, %105 : vector<4x256xf32>
      %107 = arith.addf %95, %106 : vector<4x256xf32>
      %c0_36 = arith.constant 0 : index
      %c6_37 = arith.constant 6 : index
      %108 = vector.load %arg7[%c0_36, %c6_37] : memref<4x8xf32, #tpu.memory_space<vmem>>, vector<4x1xf32>
      %109 = vector.extract_strided_slice %73 {offsets = [6, 0], sizes = [1, 256], strides = [1, 1]} : vector<8x256xf32> to vector<1x256xf32>
      %110 = vector.broadcast %108 : vector<4x1xf32> to vector<4x256xf32>
      %111 = vector.broadcast %109 : vector<1x256xf32> to vector<4x256xf32>
      %112 = arith.mulf %110, %111 : vector<4x256xf32>
      %113 = arith.addf %101, %112 : vector<4x256xf32>
      %c0_38 = arith.constant 0 : index
      %c7 = arith.constant 7 : index
      %114 = vector.load %arg7[%c0_38, %c7] : memref<4x8xf32, #tpu.memory_space<vmem>>, vector<4x1xf32>
      %115 = vector.extract_strided_slice %73 {offsets = [7, 0], sizes = [1, 256], strides = [1, 1]} : vector<8x256xf32> to vector<1x256xf32>
      %116 = vector.broadcast %114 : vector<4x1xf32> to vector<4x256xf32>
      %117 = vector.broadcast %115 : vector<1x256xf32> to vector<4x256xf32>
      %118 = arith.mulf %116, %117 : vector<4x256xf32>
      %119 = arith.addf %107, %118 : vector<4x256xf32>
      %120 = arith.addf %113, %119 : vector<4x256xf32>
      %c0_39 = arith.constant 0 : index
      %c0_40 = arith.constant 0 : index
      %121 = vector.load %arg8[%c0_39, %c0_40] : memref<4x1xf32, #tpu.memory_space<vmem>>, vector<4x1xf32>
      %122 = vector.broadcast %121 : vector<4x1xf32> to vector<4x256xf32>
      %123 = arith.addf %122, %120 : vector<4x256xf32>
      %cst_41 = arith.constant 0.000000e+00 : f32
      %124 = vector.broadcast %cst_41 : f32 to vector<4x256xf32>
      %125 = arith.cmpf oge, %123, %124 : vector<4x256xf32>
      %126 = vector.broadcast %1 : f32 to vector<4x256xf32>
      %127 = arith.mulf %126, %123 : vector<4x256xf32>
      %128 = arith.select %125, %123, %127 : vector<4x256xi1>, vector<4x256xf32>
      %c0_42 = arith.constant 0 : index
      %c0_43 = arith.constant 0 : index
      %129 = arith.index_cast %7 : i32 to index
      %130 = vector.load %arg10[%c0_42, %c0_43, %129] : memref<1x4x1280xf32, #tpu.memory_space<vmem>>, vector<1x4x256xf32>
      %131 = vector.shape_cast %130 : vector<1x4x256xf32> to vector<4x256xf32>
      %132 = vector.shape_cast %128 : vector<4x256xf32> to vector<1x4x256xf32>
      tpu.vector_store %arg10[%c0_42, %c0_43, %129], %132 {strides = array<i32>} : memref<1x4x1280xf32, #tpu.memory_space<vmem>>, vector<1x4x256xf32>,
    }
    %c5_i32_0 = arith.constant 5 : i32
    return
  }
  func.func @transform_0(%arg0: i32, %arg1: i32) -> (i32, i32, i32, i32) {
    %c0_i32 = arith.constant 0 : i32
    %c0_i32_0 = arith.constant 0 : i32
    %c0_i32_1 = arith.constant 0 : i32
    return %arg0, %arg1, %c0_i32, %c0_i32_0 : i32, i32, i32, i32
  }
  func.func @transform_1(%arg0: i32, %arg1: i32) -> (i32, i32) {
    %c0_i32 = arith.constant 0 : i32
    %c0_i32_0 = arith.constant 0 : i32
    %c0_i32_1 = arith.constant 0 : i32
    return %c0_i32, %c0_i32_0 : i32, i32
  }
  func.func @transform_2(%arg0: i32, %arg1: i32) -> (i32, i32) {
    %c0_i32 = arith.constant 0 : i32
    %c0_i32_0 = arith.constant 0 : i32
    %c0_i32_1 = arith.constant 0 : i32
    return %c0_i32, %c0_i32_0 : i32, i32
  }
  func.func @transform_3(%arg0: i32, %arg1: i32) -> (i32, i32) {
    %c0_i32 = arith.constant 0 : i32
    %c0_i32_0 = arith.constant 0 : i32
    %c0_i32_1 = arith.constant 0 : i32
    return %c0_i32, %c0_i32_0 : i32, i32
  }
  func.func @transform_4(%arg0: i32, %arg1: i32) -> (i32, i32) {
    %c0_i32 = arith.constant 0 : i32
    %c0_i32_0 = arith.constant 0 : i32
    %c0_i32_1 = arith.constant 0 : i32
    return %c0_i32, %c0_i32_0 : i32, i32
  }
  func.func @transform_5(%arg0: i32, %arg1: i32) -> (i32, i32) {
    %c0_i32 = arith.constant 0 : i32
    %c0_i32_0 = arith.constant 0 : i32
    %c0_i32_1 = arith.constant 0 : i32
    return %c0_i32, %c0_i32_0 : i32, i32
  }
  func.func @transform_6(%arg0: i32, %arg1: i32) -> (i32, i32) {
    %c0_i32 = arith.constant 0 : i32
    %c0_i32_0 = arith.constant 0 : i32
    %c0_i32_1 = arith.constant 0 : i32
    return %c0_i32, %c0_i32_0 : i32, i32
  }
  func.func @transform_7(%arg0: i32, %arg1: i32) -> i32 {
    %c0_i32 = arith.constant 0 : i32
    %c0_i32_0 = arith.constant 0 : i32
    return %c0_i32 : i32
  }
  func.func @transform_8(%arg0: i32, %arg1: i32) -> (i32, i32, i32) {
    %c0_i32 = arith.constant 0 : i32
    %c0_i32_0 = arith.constant 0 : i32
    return %arg0, %c0_i32, %arg1 : i32, i32, i32
  }
}

</mosaic_0001>

<bundles_post_ra>
// kernel: tpu_custom_call.1
= control target key start
LH: loop header
LB: loop body
LE: loop exit
PB: predicated region body
PF: predicated region fallthrough
CT: control target
= control target key end

     0   :  { %s1792_s0 = inlined_call_operand.hbm [shape: f32[2,2,2,1408], index: 0, kind: input, shape index: {}]   ;;  %s1793_s1 = inlined_call_operand.hbm [shape: f32[5,1280], index: 1, kind: input, shape index: {}]   ;;  %s1794_s2 = inlined_call_operand.hbm [shape: s32[8,1280], index: 2, kind: input, shape index: {}]   ;;  %s1795_s3 = inlined_call_operand.vmem [shape: f32[8,5], index: 3, kind: input, shape index: {}]   ;;  %s1796_s4 = inlined_call_operand.vmem [shape: f32[8,1], index: 4, kind: input, shape index: {}]   ;;  %s1797_s5 = inlined_call_operand.vmem [shape: f32[4,8], index: 5, kind: input, shape index: {}]   ;;  %s1798_s6 = inlined_call_operand.vmem [shape: f32[4,1], index: 6, kind: input, shape index: {}]   ;;  %s1799_s7 = inlined_call_operand.vmem [shape: f32[2], index: 7, kind: input, shape index: {}]   ;;  %s1800_s8 = inlined_call_operand.hbm [shape: f32[2,4,2560], index: 8, kind: output, shape index: {}]  }
   0x1   :  { %1810 = sst [smem:[#allocation21_spill]] %s1793_s1 }
   0x2   :  { %1811 = sst [smem:[#allocation22_spill]] %s1794_s2 }
   0x3   :  { %1812 = sst [smem:[#allocation23_spill]] %s1799_s7 }
   0x4   :  { %1813 = sst [smem:[#allocation24_spill]] %s1800_s8 }
   0x5   :  { %13 = vsyncpa [#allocation4], 0 }
   0x6   :  { %15 = vsyncpa [#allocation4 + $0x1], 0 }
   0x7   :  { %16 = vsyncpa [#allocation8], 0 }
   0x8   :  { %17 = vsyncpa [#allocation6], 0 }
   0x9   :  { %18 = vsyncpa [#allocation5], 0 }
   0xa   :  { %20 = vsyncpa [#allocation5 + $0x1], 0  ;;  %s1375_s27 = smov 0   ;;  %s1377_s28 = smov 0  }
   0xb   :  { %s1379_s29 = smov 0   ;;  %s1381_s30 = smov 0  }
   0xc   :  { %s1383_s9 = smov 0   ;;  %s1385_s10 = smov 0  }
   0xd   :  { %s1387_s11 = smov 0   ;;  %s1389_s12 = smov 0  }
   0xe LB: > { %1814 = sst [smem:[#allocation16_spill]] %s1278_s27  ;;  %s917_s13 = sadd.s32 4294967295, %s1306_s12   ;;  %s1306_s12 = sphi %s1389_s12, %s26_s12   ;;  %s1302_s11 = sphi %s1387_s11, %s1856_s11   ;;  %s1298_s10 = sphi %s1385_s10, %s1855_s10   ;;  %s1294_s9 = sphi %s1383_s9, %s1854_s9   ;;  %s1290_s30 = sphi %s1381_s30, %s1853_s30   ;;  %s1286_s29 = sphi %s1379_s29, %s1852_s29   ;;  %s1282_s28 = sphi %s1377_s28, %s1851_s28   ;;  %s1278_s27 = sphi %s1375_s27, %s1850_s27  }
   0xf   : > { %1815 = sst [smem:[#allocation17_spill]] %s1294_s9  ;;  %s918_s14 = sadd.s32 4294967294, %s1306_s12  }
  0x10   : > { %p60_p0 = scmp.ne.s32.totalorder %s1282_s28, %s1278_s27  ;;  %p1419_p1 = scmp.eq.s32.totalorder %s917_s13, 0 }
  0x11   : > { %p1423_p2 = scmp.eq.s32.totalorder %s917_s13, 3  ;;  %p239_p3 = scmp.eq.s32.totalorder %s918_s14, 3 }
  0x12   : > { %s1816_s15 = scalar_select %p1419_p1, 1, 0 }
  0x13   : > { %s1817_s16 = scalar_select %p1423_p2, 1, 0 }
  0x14   : > { %p1429_p4 = por %p1419_p1, %p60_p0  ;;  %p919_p5 = scmp.ge.s32.totalorder %s1306_s12, 1 }
  0x15   : > { %p1434_p6 = por %p239_p3, %p60_p0  ;;  %p246_p7 = scmp.lt.s32.totalorder %s1306_s12, 5 }
  0x16   : > { %s1818_s17 = scalar_select %p1429_p4, 1, 0 }
  0x17   : > { %s1819_s18 = scalar_select %p1434_p6, 1, 0 }
  0x18   : > { %p1439_p8 = pnand %p919_p5, %p246_p7  ;;  %s1312_s20 = smov [#allocation7]  }
  0x19   : > { %1820 = sst [smem:[#allocation18_spill]] %s1819_s18  ;;  %s259_s21 = sshll.u32 %s1312_s20, 4  ;;  %s260_s21 = int_to_ptr.vmem [resolvable:$true] %s259_s21 }
  0x1a   : > { %s1821_s19 = scalar_select %p1439_p8, 1, 0 }
  0x1b   : > { %p967_p9 = pneg %p1439_p8  ;;  %s1313_s22 = smov [#allocation9]  }
  0x1c   : > { %s270_s23 = sshll.u32 %s1313_s22, 4  ;;  %s1822_s7 = sld [smem:[#allocation23_spill]]  ;;  %s1454_s23 = int_to_ptr.vmem [resolvable:$true] %s270_s23 }
  0x1d   : > { %p1450_p10 = pnand %p967_p9, %p1419_p1  ;;  %s1824_s1 = sld [smem:[#allocation21_spill]] }
  0x1f   : > { %p1466_p12 = pneg %p1450_p10 }
  0x22   : > { %s293_s26 = sshll.u32 %s1822_s7, 4  ;;  %s1456_s26 = int_to_ptr.vmem [resolvable:$true] %s293_s26 }
  0x23   : > { %s1095_s18 = scalar_lea.hbm %s1824_s1, 1280 }
  0x24   : > { %p1096_p11 = scmp.ne.s32.totalorder %s1824_s1, %s1095_s18  ;;  %p1102_p3 = scmp.lt.u32.totalorder %s1095_s18, %s1824_s1 }
  0x26   : > { %p1098_p13 = pnand %p1466_p12, %p1096_p11 }
  0x28   : > { %p1099_p0 = pneg %p1098_p13 }
  0x2a   : > { %p1104_p5 = pnand %p1102_p3, %p1099_p0 }
  0x2c   : > { %1107 = shalt.err (!%p1104_p5)
}
  0x2d   : > { %s1108_s14 = scalar_lea.vmem %s260_s21, 1280  ;;  %p1116_p1 = scmp.lt.s32.totalorder %s260_s21, %s260_s21 }
  0x2e   : > { %p1109_p7 = scmp.ne.s32.totalorder %s260_s21, %s1108_s14  ;;  %p1117_p4 = scmp.lt.s32.totalorder %s1108_s14, %s1108_s14 }
  0x30   : > { %p1111_p9 = pnand %p1109_p7, %p1466_p12  ;;  %p1118_p8 = por %p1117_p4, %p1116_p1 }
  0x32   : > { %p1112_p6 = pneg %p1111_p9 }
  0x34   : > { %p1119_p2 = pnand %p1118_p8, %p1112_p6 }
  0x36   : > { %1122 = shalt.err (!%p1119_p2)
}
  0x37   : > { %970 = dma.hbm_to_vmem [thread:$0]  (!%p1450_p10), %s1824_s1, 1280, %s260_s21, [#allocation8]  }
  0x38   : > { %s1826_s2 = sld [smem:[#allocation22_spill]] }
  0x3e   : > { %s1123_s22 = scalar_lea.hbm %s1826_s2, 1280 }
  0x3f   : > { %p1124_p11 = scmp.ne.s32.totalorder %s1826_s2, %s1123_s22  ;;  %p1130_p2 = scmp.lt.u32.totalorder %s1123_s22, %s1826_s2 }
  0x41   : > { %p1126_p13 = pnand %p1124_p11, %p1466_p12 }
  0x43   : > { %p1127_p1 = pneg %p1126_p13 }
  0x45   : > { %p1132_p4 = pnand %p1130_p2, %p1127_p1 }
  0x47   : > { %1135 = shalt.err (!%p1132_p4)
}
  0x48   : > { %s1136_s21 = scalar_lea.vmem %s1454_s23, 1280  ;;  %p1144_p3 = scmp.lt.s32.totalorder %s1454_s23, %s1454_s23 }
  0x49   : > { %p1137_p6 = scmp.ne.s32.totalorder %s1454_s23, %s1136_s21  ;;  %p1145_p5 = scmp.lt.s32.totalorder %s1136_s21, %s1136_s21 }
  0x4b   : > { %p1139_p8 = pnand %p1137_p6, %p1466_p12  ;;  %p1146_p7 = por %p1145_p5, %p1144_p3 }
  0x4d   : > { %p1140_p0 = pneg %p1139_p8 }
  0x4f   : > { %p1147_p9 = pnand %p1146_p7, %p1140_p0 }
  0x51   : > { %1150 = shalt.err (!%p1147_p9)
}
  0x52   : > { %973 = dma.hbm_to_vmem [thread:$0]  (!%p1450_p10), %s1826_s2, 1280, %s1454_s23, [#allocation8]  }
  0x53   : > { %s1151_s27 = scalar_lea.vmem %s1456_s26, 16  ;;  %p1159_p2 = scmp.lt.s32.totalorder %s1456_s26, %s1456_s26 }
  0x54   : > { %p1152_p11 = scmp.ne.s32.totalorder %s1456_s26, %s1151_s27  ;;  %p1160_p4 = scmp.lt.s32.totalorder %s1151_s27, %s1151_s27 }
  0x56   : > { %p1154_p13 = pnand %p1152_p11, %p1466_p12  ;;  %p1161_p6 = por %p1160_p4, %p1159_p2 }
  0x58   : > { %p1155_p1 = pneg %p1154_p13 }
  0x5a   : > { %p1162_p8 = pnand %p1161_p6, %p1155_p1 }
  0x5c   : > { %1165 = shalt.err (!%p1162_p8)
}
  0x5d   : > { %s1314_s20 = smov [#allocation10]   ;;  %s35_s23 = sadd.s32 1, %s1298_s10 }
  0x5e   : > { %976 = dma.vmem_to_smem (!%p1450_p10), %s1456_s26, 16, %s1314_s20, [#allocation6]  }
  0x5f   : > { %p36_p12 = scmp.ge.s32.totalorder %s35_s23, 2  ;;  %s38_s24 = sadd.s32 1, %s1302_s11 }
  0x60   : > { %s47_s7 = sadd.s32 1, %s1286_s29  ;;  %p54_p0 = scmp.ne.s32.totalorder %s1286_s29, %s1282_s28 }
  0x61   : > { %s1858_s23 = smov (%p36_p12, %s35_s23), 0  ;;  %s1860_s24 = smov (!%p36_p12, %s38_s24), %s1302_s11 }
  0x62   : > { %1827 = sst [smem:[#allocation19_spill]] %s1858_s23  ;;  %s43_s13 = ssub.s32 %s1298_s10, %s1858_s23 }
  0x63   : > { %p55_p3 = scmp.eq.s32.totalorder %s1306_s12, 0  ;;  %p40_p5 = scmp.ge.s32.totalorder %s1860_s24, 2 }
  0x64   : > { %p1828_p7 = scmp.ne.s32.totalorder %s1817_s16, 0  ;;  %p988_p11 = scmp.lt.s32.totalorder %s1306_s12, 4 }
  0x65   : > { %p56_p10 = por %p55_p3, %p54_p0  ;;  %s1862_s24 = smov (%p40_p5, %s1860_s24), 0 }
  0x66   : > { %p1527_p9 = por %p1828_p7, %p54_p0  ;;  %1830 = sst [smem:[#allocation20_spill]] %s1862_s24 }
  0x67   : > { %s304_s26 = sand.u32 1, %s1286_s29   ;;  %s946_s22 = smul.u32 11, %s1298_s10 }
  0x68   : > { %s42_s25 = ssub.s32 %s1302_s11, %s1862_s24  ;;  %s945_s21 = smul.u32 22, %s304_s26 }
  0x69   : > { %s44_s14 = sor.u32 %s43_s13, %s42_s25  ;;  %s947_s8 = smul.u32 22, %s1302_s11 }
  0x6a   : > { %p45_p13 = scmp.eq.s32.totalorder %s44_s14, 0  ;;  %p1539_p1 = pnand %p988_p11, %p56_p10 }
  0x6b   : > { %s314_s27 = sadd.s32 %s947_s8, %s946_s22  ;;  %s308_s20 = scalar_lea.vmem [#allocation3], %s945_s21 }
  0x6c   : > { %s1544_s16 = scalar_select %p45_p13, %s1286_s29, %s47_s7  }
  0x6d   : > { %s318_s1 = sshll.u32 %s308_s20, 4  ;;  %s924_s2 = sshll.u32 %s314_s27, 5  ;;  %s1546_s1 = int_to_ptr.vmem [resolvable:$true] %s318_s1 }
  0x6e   : > { %s1551_s13 = scalar_lea.hbm %s1792_s0, %s924_s2  ;;  %s305_s25 = scalar_lea.sflag [#allocation4], %s304_s26 }
  0x6f   : > { %s1166_s14 = scalar_lea.hbm %s1551_s13, 352  ;;  %p1168_p4 = pneg %p1539_p1 }
  0x70   : > { %p1167_p2 = scmp.ne.s32.totalorder %s1551_s13, %s1166_s14  ;;  %s1171_s21 = scalar_lea.hbm %s1792_s0, 1408 }
  0x71   : > { %p1172_p12 = scmp.lt.u32.totalorder %s1551_s13, %s1792_s0  ;;  %p1173_p0 = scmp.lt.u32.totalorder %s1171_s21, %s1166_s14 }
  0x72   : > { %p1169_p6 = pnand %p1168_p4, %p1167_p2  ;;  %p1175_p5 = scmp.lt.u32.totalorder %s1166_s14, %s1551_s13 }
  0x73   : > { %p1174_p3 = por %p1173_p0, %p1172_p12 }
  0x74   : > { %p1170_p8 = pneg %p1169_p6 }
  0x75   : > { %p1176_p7 = por %p1175_p5, %p1174_p3 }
  0x77   : > { %p1177_p10 = pnand %p1176_p7, %p1170_p8 }
  0x79   : > { %1180 = shalt.err (!%p1177_p10)
}
  0x7a   : > { %s1181_s24 = scalar_lea.vmem %s1546_s1, 352  ;;  %s1315_s26 = smov [#allocation3]  }
  0x7b   : > { %p1182_p11 = scmp.ne.s32.totalorder %s1546_s1, %s1181_s24  ;;  %s1186_s8 = sshll.u32 %s1315_s26, 4  ;;  %s1187_s8 = int_to_ptr.vmem [resolvable:$false] %s1186_s8 }
  0x7c   : > { %s1188_s27 = scalar_lea.vmem %s1187_s8, 704  ;;  %p1189_p6 = scmp.lt.s32.totalorder %s1546_s1, %s1187_s8 }
  0x7d   : > { %p1184_p13 = pnand %p1182_p11, %p1168_p4  ;;  %p1190_p12 = scmp.lt.s32.totalorder %s1188_s27, %s1181_s24 }
  0x7f   : > { %p1185_p2 = pneg %p1184_p13  ;;  %p1191_p0 = por %p1190_p12, %p1189_p6 }
  0x81   : > { %p1192_p3 = pnand %p1191_p0, %p1185_p2 }
  0x83   : > { %1195 = shalt.err (!%p1192_p3)
}
  0x84   : > { %980 = dma.hbm_to_vmem [thread:$0]  (!%p1539_p1), %s1551_s13, 352, %s1546_s1, %s305_s25  }
  0x85   : > { %p1832_p8 = scmp.ne.s32.totalorder %s1821_s19, 0 }
  0x86   : > { %s1581_s20 = sand.u32 (!%p1832_p8), 1, %s1282_s28   ;;  %p1833_p4 = scmp.ne.s32.totalorder (!%p1832_p8), %s1818_s17, 0 }
  0x87   : > { %327 = sbr.rel (%p1832_p8) target bundleno = 379 (0x17b), region = 52  ;;  %s330_s7 = scalar_lea.sflag (!%p1832_p8), [#allocation4], %s1581_s20 }
  0x88   : > { %s948_s14 = smul.u32 (!%p1832_p8), 22, %s1581_s20 }
  0x8a   : > { %s1585_s22 = scalar_lea.vmem (!%p1832_p8), [#allocation3], %s948_s14 }
  0x8e   : > { %1261 = dma.done.wait (%p1833_p4), %s330_s7, 352  }
  0x8f   : > { %1263 = vsyncadd (%p1833_p4), %s330_s7, 4294966944  ;;  %p1834_p1 = scmp.ne.s32.totalorder %s1816_s15, 0 }
  0x91   : > { %1265 = dma.done.wait (%p1834_p1), [#allocation8], 2560  }
  0x92   : > { %1267 = vsyncadd (%p1834_p1), [#allocation8], 4294964736 }
  0x93   : > { %1269 = dma.done.wait (%p1834_p1), [#allocation6], 16  }
  0x94   : > { %1271 = vsyncadd (%p1834_p1), [#allocation6], 4294967280 }
  0x95   : > { %350 = sfence }
  0x96   : > { %s949_s1 = smul.u32 40, %s1581_s20  ;;  %s1600_s19 = sld [smem:[#allocation10]] }
  0x97   : > { %s1602_s17 = sld [smem:[#allocation10 + $0x1]]  ;;  %s930_s9 = sshll.u32 %s1290_s30, 9 }
  0x98   : > { %s1605_s13 = ssub.s32 145, %s930_s9  ;;  %s1607_s25 = ssub.s32 385, %s930_s9 }
  0x99   : > { %s1609_s21 = scalar_lea.vmem [#allocation11], %s949_s1  ;;  %s1611_s23 = smov 0  }
  0x9a LB: >> { %v457_v0 = vld [vmem:[%s1795_s3] sm:$0xff]  ;;  %v1316_v1 = vmov 1   ;;  %v1317_v2 = vmov 2   ;;  %v402_v3 = vlaneseq  ;;  %s931_s24 = sshll.u32 %s1310_s23, 8  ;;  %v1318_v4 = vmov 1983009808   ;;  %s1310_s23 = sphi %s1611_s23, %s390_s23  }
  0x9b   : >> { %1083 = vset.pattern.permute.xlu1 %v1316_v1  ;;  %1081 = vset.pattern.permute.xlu0 %v1317_v2  ;;  %v400_v5 = vunpack.c.l.s4 %v1318_v4  ;;  %s1622_s26 = sshra.s32 %s931_s24, 7  ;;  %v1319_v8 = vmov 3   ;;  %v1320_v9 = vmov 0   ;;  %v1321_v19 = vmov 4   ;;  %s1322_s1 = smov 126   ;;  %v594_v34 = vld [vmem:[%s1796_s4] sm:$0xff] }
  0x9c   : >> { %500 = vperm.xlu1 %1083, %v457_v0   ;;  %527 = vperm.xlu0 %1081, %v457_v0   ;;  %v1624_v6 = vshrl.u32 %v402_v3, 7  ;;  %s932_s8 = sshll.u32 %s1622_s26, 1  ;;  %s939_s14 = sshll.u32 %s1622_s26, 3  ;;  %v619_v33 = vld [vmem:[%s1797_s5] sm:$0xf]  ;;  %v1326_v35 = vmov 5  }
  0x9d   : >> { %v401_v7 = vunpack.c.0.s8 %v400_v5  ;;  %s395_s27 = scalar_lea.vmem %s1585_s22, %s932_s8 [#allocation3]  ;;  %s450_s7 = scalar_lea.vmem [#allocation7], %s939_s14  ;;  %v747_v36 = vld [vmem:[%s1798_s6] sm:$0xf]  ;;  %v1327_v37 = vmov 6   ;;  %v1328_v38 = vmov 7   ;;  %vm519_vm0 = vcmask 1031168  }
  0x9e   : >> { %v396_v10 = vld [vmem:[%s395_s27] sm:$0x3f]  ;;  %v1633_v23 = vsub.s32 0, %v1624_v6  ;;  %v1639_v25 = vld [vmem:[%s450_s7 + $0x8] sm:$0x1f]  ;;  %s1323_s9 = smov 127  }
  0x9f   : >> { %v404_v11 = vsub.s32 %v401_v7, %v1624_v6  ;;  %933 = vst.sshfl [vmem:[#allocation2] sm:$0x3 pattern:$0x76325410] %v396_v10  ;;  %v420_v12 = vcombine.low %v396_v10, %v396_v10  ;;  %v398_v13 = vcombine.high %v396_v10, %v396_v10  ;;  %v1637_v24 = vld [vmem:[%s450_s7] sm:$0x1f] }
  0xa0   : >> { %1084 = vset.pattern.permute.xlu1 %v1319_v8  ;;  %1082 = vset.pattern.permute.xlu0 %v1320_v9  ;;  %936 = vst.sshfl [vmem:[#allocation2 + $0x10] sm:$0x30 pattern:$0x76325410] %v396_v10  ;;  %v461_v26 = vrot.slane %v1637_v24, %v1633_v23  ;;  %v465_v27 = vrot.slane %v1639_v25, %v1633_v23  ;;  %s1324_s15 = smov 125   ;;  %s1325_s2 = smov 124  }
  0xa1   : >> { %556 = vperm.xlu1 %1084, %v457_v0   ;;  %470 = vperm.xlu0 %1082, %v457_v0   ;;  %937 = vst.sshfl [vmem:[#allocation2 + $0x8] sm:$0xc pattern:$0x76325410] %v396_v10  ;;  %v405_v14 = vrot.slane %v396_v10, %v404_v11  ;;  %v427_v15 = vrot.slane %v420_v12, %v404_v11  ;;  %v1660_v43 = vsub.s32 2, %v1624_v6  ;;  %v1667_v62 = vsub.s32 3, %v1624_v6 }
  0xa2   : >> { %935 = vst.sshfl [vmem:[#allocation2] sm:$0x30 pattern:$0x76325410] %v420_v12  ;;  %v412_v16 = vrot.slane %v398_v13, %v404_v11  ;;  %vm492_vm1 = vcmask 1039360   ;;  %vm548_vm2 = vcmask 1022976  }
  0xa3   : >> { %938 = vst.sshfl [vmem:[#allocation2 + $0x8] sm:$0xc0 pattern:$0x76325410] %v420_v12  ;;  %v434_v17 = vcombine.low %v405_v14, %v405_v14  ;;  %v413_v18 = vcombine.high %v405_v14, %v405_v14  ;;  %v441_v20 = vcombine.low %v427_v15, %v427_v15  ;;  %v428_v21 = vcombine.high %v427_v15, %v427_v15  ;;  %s390_s23 = sadd.s32 1, %s1310_s23  }
  0xa4   : >> { %934 = vst.sshfl [vmem:[#allocation2 + $0x10] sm:$0x3 pattern:$0x76325410] %v398_v13  ;;  %v435_v22 = vcombine.low %v412_v16, %v412_v16  ;;  %v508_v46 = vrot.slane %v1637_v24, %v1660_v43  ;;  %v512_v47 = vrot.slane %v1639_v25, %v1660_v43  ;;  %v1675_v3 = vsub.s32 4, %v1624_v6  ;;  %p387_p5 = scmp.ge.s32.totalorder %s390_s23, 5  }
  0xa5   : >> { %1085 = vset.pattern.permute.xlu1 %v1321_v19  ;;  %438 = vst [vmem:[#allocation2] sm:$0x30] %v434_v17  ;;  %445 = vst [vmem:[#allocation2 + $0x10] sm:$0xc0] %v434_v17  ;;  %v541_v11 = vrot.slane %v1639_v25, %v1667_v62  ;;  %vm577_vm3 = vcmask 1014784   ;;  %s1843_s24 = sld [smem:[#allocation17_spill]] (%p387_p5) }
  0xa6   : >> { %585 = vperm.xlu1 %1085, %v457_v0   ;;  %418 = vst [vmem:[#allocation2 + $0x8] sm:$0x3] %v413_v18  ;;  %443 = vst [vmem:[#allocation2] sm:$0xc0] %v441_v20  ;;  %v1670_v0 = vsub.s32 1, %v1624_v6  ;;  %v566_v12 = vrot.slane %v1637_v24, %v1675_v3  ;;  %s786_s27 = sshll.u32 (%p387_p5), %s1609_s21, 4  ;;  %s1742_s27 = int_to_ptr.vmem [resolvable:$true] %s786_s27 }
  0xa7   : >> { %432 = vst [vmem:[#allocation2 + $0x8] sm:$0xc] %v428_v21  ;;  %440 = vst [vmem:[#allocation2 + $0x10] sm:$0x30] %v435_v22  ;;  %s1196_s22 = scalar_lea.vmem (%p387_p5), %s1742_s27, 640 }
  0xa8   : >> { %v478_v5 = vrot.slane %v1637_v24, %v1670_v0  ;;  %v482_v16 = vrot.slane %v1639_v25, %v1670_v0  ;;  %p1197_p7 = scmp.ne.s32.totalorder (%p387_p5), %s1742_s27, %s1196_s22 }
  0xaa   : >> { %1086 = vset.pattern.permute.xlu1 %v1320_v9  ;;  %p1198_p10 = pnand (%p387_p5), %p1197_p7, %p1527_p9 }
  0xab   : > { %s950_s8 = smul.u32 (%p387_p5), 20, %s1843_s24 }
  0xac   : > { %p1199_p11 = pneg (%p387_p5), %p1198_p10 }
  0xad   : >> { %v446_v28 = vld [vmem:[#allocation2] sm:$0xff] }
  0xae   : >> { %v447_v29 = vld [vmem:[#allocation2 + $0x8] sm:$0xff]  ;;  %513 = vrot.lane.b32.xlu0 %v446_v28, %s1322_s1  ;;  %v466_v30 = vmul.f32 %v461_v26, %v446_v28  ;;  %v448_v32 = vld [vmem:[#allocation2 + $0x10] sm:$0xff] }
  0xaf   : >> { %515 = vrot.lane.b32.xlu1 %v447_v29, %s1322_s1  ;;  %v467_v31 = vmul.f32 %v465_v27, %v447_v29 }
  0xb2   : >> { %517 = vrot.lane.b32.xlu0 %v448_v32, %s1322_s1 }
  0xb3   : >> { %486 = vrot.lane.b32.xlu1 %v446_v28, %s1323_s9 }
  0xb6   : >> { %488 = vrot.lane.b32.xlu0 %v447_v29, %s1323_s9 }
  0xb7   : >> { %490 = vrot.lane.b32.xlu1 %v448_v32, %s1323_s9 }
  0xba   : >> { %542 = vrot.lane.b32.xlu0 %v446_v28, %s1324_s15 }
  0xbb   : >> { %544 = vrot.lane.b32.xlu1 %v447_v29, %s1324_s15 }
  0xbe   : >> { %546 = vrot.lane.b32.xlu0 %v448_v32, %s1324_s15  ;;  %s454_s15 = scalar_lea.vmem [#allocation9], %s939_s14  ;;  %s941_s14 = sshll.u32 %s1622_s26, 2 }
  0xbf   : >> { %571 = vrot.lane.b32.xlu1 %v446_v28, %s1325_s2  ;;  %s777_s26 = smul.u32 (%p387_p5), 10, %s1290_s30  ;;  %s1329_s30 = smov (%p387_p5), [#allocation11]  }
  0xc1   : > { %s782_s7 = sadd.s32 (%p387_p5), %s950_s8, %s777_s26 }
  0xc2   : >> { %573 = vrot.lane.b32.xlu0 %v447_v29, %s1325_s2  ;;  %s942_s1 = sshll.u32 (%p387_p5), %s782_s7, 6 }
  0xc3   : >> { %575 = vrot.lane.b32.xlu1 %v448_v32, %s1325_s2  ;;  %s767_s2 = scalar_lea.vmem %s1609_s21, %s941_s14 [#allocation11]  ;;  %s1844_s14 = sld [smem:[#allocation24_spill]] (%p387_p5) }
  0xc6   : >> { %597 = vperm.xlu0 %1082, %v594_v34  }
  0xc7   : >> { %622 = vperm.xlu1 %1086, %v619_v33  }
  0xc9   : > { %s784_s23 = scalar_lea.hbm (%p387_p5), %s1844_s14, %s942_s1 }
  0xca   : >> { %1088 = vset.pattern.permute.xlu0 %v1317_v2  ;;  %v537_v2 = vrot.slane %v1637_v24, %v1667_v62  ;;  %v570_v24 = vrot.slane %v1639_v25, %v1675_v3  ;;  %v612_v25 = vstv %s1607_s25 }
  0xcb   : >> { %1087 = vset.pattern.permute.xlu1 %v1316_v1  ;;  %650 = vperm.xlu0 %1088, %v619_v33  }
  0xcc   : >> { %636 = vperm.xlu1 %1087, %v619_v33  }
  0xcf   : >> { %1091 = vset.pattern.permute.xlu0 %v1326_v35 }
  0xd0   : >> { %1089 = vset.pattern.permute.xlu1 %v1319_v8  ;;  %698 = vperm.xlu0 %1091, %v619_v33  }
  0xd1   : >> { %666 = vperm.xlu1 %1089, %v619_v33  }
  0xd4   : >> { %1094 = vset.pattern.permute.xlu0 %v1320_v9 }
  0xd5   : >> { %1090 = vset.pattern.permute.xlu1 %v1321_v19  ;;  %750 = vperm.xlu0 %1094, %v747_v36  }
  0xd6   : >> { %682 = vperm.xlu1 %1090, %v619_v33  }
  0xda   : >> { %1092 = vset.pattern.permute.xlu1 %v1327_v37 }
  0xdb   : >> { %714 = vperm.xlu1 %1092, %v619_v33  }
  0xdf   : >> { %1093 = vset.pattern.permute.xlu1 %v1328_v38  ;;  %v455_v38 = vld [vmem:[%s454_s15] sm:$0xff] }
  0xe0   : >> { %730 = vperm.xlu1 %1093, %v619_v33   ;;  %vm1699_vm5 = vcmp.lt.s32.totalorder %v455_v38, %v612_v25 }
 0x11b   : >> { %v501_v39 = vpop.permute.xlu1 %500  ;;  %v528_v40 = vpop.permute.xlu0 %527 }
 0x120   : >> { %v557_v41 = vpop.permute.xlu1 %556  ;;  %v471_v42 = vpop.permute.xlu0 %470 }
 0x121   : >> { %v473_v52 = vmul.f32 %v471_v42, %v466_v30  ;;  %v474_v53 = vmul.f32 %v471_v42, %v467_v31  ;;  %v456_v42 = vld [vmem:[%s454_s15 + $0x8] sm:$0xff] }
 0x122   : >> { %vm1708_vm7 = vcmp.lt.s32.totalorder %v456_v42, %v612_v25 }
 0x124   : >> { %v514_v44 = vpop.permute.xlu0 %513 }
 0x125   : >> { %v586_v45 = vpop.permute.xlu1 %585 }
 0x128   : >> { %v518_v48 = vpop.permute.xlu0 %517 }
 0x129   : >> { %v516_v49 = vpop.permute.xlu1 %515 }
 0x12a   : >> { %v520_v50 = vsel %vm519_vm0, %v514_v44, %v516_v49  ;;  %v521_v51 = vsel %vm519_vm0, %v516_v49, %v518_v48 }
 0x12b   : >> { %v524_v54 = vmul.f32 %v520_v50, %v508_v46  ;;  %v525_v55 = vmul.f32 %v521_v51, %v512_v47 }
 0x12c   : >> { %v489_v56 = vpop.permute.xlu0 %488 }
 0x12d   : >> { %v530_v57 = vmul.f32 %v528_v40, %v524_v54  ;;  %v531_v58 = vmul.f32 %v528_v40, %v525_v55  ;;  %v487_v59 = vpop.permute.xlu1 %486  ;;  %v609_v40 = vstv %s1605_s13 }
 0x12e   : >> { %v493_v8 = vsel %vm492_vm1, %v487_v59, %v489_v56  ;;  %vm1695_vm4 = vcmp.ge.s32.totalorder %v455_v38, %v609_v40  ;;  %vm1704_vm6 = vcmp.ge.s32.totalorder %v456_v42, %v609_v40 }
 0x12f   : >> { %v532_v60 = vadd.f32 %v530_v57, %v473_v52  ;;  %v533_v61 = vadd.f32 %v531_v58, %v474_v53  ;;  %v497_v15 = vmul.f32 %v493_v8, %v478_v5  ;;  %vm615_vm8 = vmand %vm1695_vm4, %vm1699_vm5 }
 0x130   : >> { %v543_v63 = vpop.permute.xlu0 %542  ;;  %vm616_vm9 = vmand %vm1704_vm6, %vm1708_vm7 }
 0x131   : >> { %v491_v1 = vpop.permute.xlu1 %490  ;;  %v503_v26 = vmul.f32 %v501_v39, %v497_v15 }
 0x132   : >> { %v494_v18 = vsel %vm492_vm1, %v489_v56, %v491_v1  ;;  %v719_v1 = vsub.s32 6, %v1624_v6 }
 0x133   : >> { %v498_v27 = vmul.f32 %v494_v18, %v482_v16 }
 0x134   : >> { %v547_v4 = vpop.permute.xlu0 %546 }
 0x135   : >> { %v545_v7 = vpop.permute.xlu1 %544  ;;  %v504_v35 = vmul.f32 %v501_v39, %v498_v27 }
 0x136   : >> { %v549_v9 = vsel %vm548_vm2, %v543_v63, %v545_v7  ;;  %v550_v13 = vsel %vm548_vm2, %v545_v7, %v547_v4 }
 0x137   : >> { %v553_v10 = vmul.f32 %v549_v9, %v537_v2  ;;  %v554_v21 = vmul.f32 %v550_v13, %v541_v11  ;;  %v735_v2 = vsub.s32 7, %v1624_v6 }
 0x138   : >> { %v574_v14 = vpop.permute.xlu0 %573 }
 0x139   : >> { %v572_v17 = vpop.permute.xlu1 %571  ;;  %v559_v20 = vmul.f32 %v557_v41, %v553_v10  ;;  %v560_v31 = vmul.f32 %v557_v41, %v554_v21 }
 0x13a   : >> { %v578_v19 = vsel %vm577_vm3, %v572_v17, %v574_v14 }
 0x13b   : >> { %v582_v22 = vmul.f32 %v578_v19, %v566_v12  ;;  %v561_v33 = vadd.f32 %v559_v20, %v503_v26  ;;  %v562_v44 = vadd.f32 %v560_v31, %v504_v35 }
 0x13d   : >> { %v588_v28 = vmul.f32 %v586_v45, %v582_v22  ;;  %v576_v29 = vpop.permute.xlu1 %575 }
 0x13e   : >> { %v579_v30 = vsel %vm577_vm3, %v574_v14, %v576_v29 }
 0x13f   : >> { %v583_v32 = vmul.f32 %v579_v30, %v570_v24  ;;  %v590_v34 = vadd.f32 %v588_v28, %v532_v60  ;;  %v703_v60 = vsub.s32 5, %v1624_v6 }
 0x141   : >> { %v589_v36 = vmul.f32 %v586_v45, %v583_v32  ;;  %v592_v37 = vadd.f32 %v590_v34, %v561_v33  ;;  %v604_v45 = vstv %s1600_s19  ;;  %s1200_s19 = sshll.u32 (%p387_p5), %s1329_s30, 4  ;;  %s1201_s19 = int_to_ptr.vmem [resolvable:$false] %s1200_s19 }
 0x142   : > { %p1203_p13 = scmp.lt.s32.totalorder (%p387_p5), %s1742_s27, %s1201_s19 }
 0x143   : >> { %v591_v46 = vadd.f32 %v589_v36, %v533_v61 }
 0x145   : >> { %v593_v47 = vadd.f32 %v591_v46, %v562_v44  ;;  %v598_v51 = vpop.permute.xlu0 %597 }
 0x146   : >> { %v623_v39 = vpop.permute.xlu1 %622  ;;  %v600_v52 = vadd.f32 %v598_v51, %v592_v37 }
 0x147   : >> { %v601_v53 = vadd.f32 %v598_v51, %v593_v47 }
 0x148   : >> { %vm602_vm10 = vcmp.ge.f32.partialorder %v600_v52, 0.0  ;;  %v605_v54 = vmul.f32 %v604_v45, %v600_v52 }
 0x149   : >> { %vm603_vm11 = vcmp.ge.f32.partialorder %v601_v53, 0.0  ;;  %v606_v55 = vmul.f32 %v604_v45, %v601_v53 }
 0x14a   : >> { %v607_v56 = vsel %vm602_vm10, %v600_v52, %v605_v54  ;;  %v651_v59 = vpop.permute.xlu0 %650 }
 0x14b   : >> { %v608_v57 = vsel %vm603_vm11, %v601_v53, %v606_v55  ;;  %v637_v58 = vpop.permute.xlu1 %636  ;;  %v617_v61 = vsel %vm615_vm8, %v607_v56, 0.0  ;;  %v757_v53 = vstv %s1602_s17  ;;  %s1202_s17 = scalar_lea.vmem (%p387_p5), %s1201_s19, 1280 }
 0x14c   : >> { %v618_v63 = vsel %vm616_vm9, %v608_v57, 0.0  ;;  %v642_v4 = vrot.slane %v617_v61, %v1670_v0  ;;  %v628_v7 = vrot.slane %v617_v61, %v1633_v23  ;;  %v656_v9 = vrot.slane %v617_v61, %v1660_v43  ;;  %p1204_p2 = scmp.lt.s32.totalorder (%p387_p5), %s1202_s17, %s1196_s22 }
 0x14d   : >> { %v646_v5 = vrot.slane %v618_v63, %v1670_v0  ;;  %v632_v8 = vrot.slane %v618_v63, %v1633_v23  ;;  %v660_v10 = vrot.slane %v618_v63, %v1660_v43  ;;  %v672_v11 = vrot.slane %v617_v61, %v1667_v62 }
 0x14e   : >> { %v676_v12 = vrot.slane %v618_v63, %v1667_v62  ;;  %v647_v13 = vmul.f32 %v642_v4, %v637_v58  ;;  %v633_v15 = vmul.f32 %v628_v7, %v623_v39  ;;  %v661_v16 = vmul.f32 %v656_v9, %v651_v59  ;;  %p1205_p6 = por (%p387_p5), %p1204_p2, %p1203_p13 }
 0x14f   : >> { %v648_v14 = vmul.f32 %v646_v5, %v637_v58  ;;  %v634_v6 = vmul.f32 %v632_v8, %v623_v39  ;;  %v662_v17 = vmul.f32 %v660_v10, %v651_v59  ;;  %v704_v0 = vrot.slane %v617_v61, %v703_v60  ;;  %v699_v20 = vpop.permute.xlu0 %698 }
 0x150   : >> { %v667_v18 = vpop.permute.xlu1 %666  ;;  %v708_v19 = vrot.slane %v618_v63, %v703_v60  ;;  %v688_v22 = vrot.slane %v617_v61, %v1675_v3  ;;  %v692_v43 = vrot.slane %v618_v63, %v1675_v3  ;;  %v663_v24 = vadd.f32 %v661_v16, %v633_v15  ;;  %p1206_p12 = pnand (%p387_p5), %p1205_p6, %p1199_p11 }
 0x151   : >> { %v677_v21 = vmul.f32 %v672_v11, %v667_v18  ;;  %v678_v23 = vmul.f32 %v676_v12, %v667_v18  ;;  %v664_v26 = vadd.f32 %v662_v17, %v634_v6  ;;  %v709_v27 = vmul.f32 %v704_v0, %v699_v20 }
 0x152   : >> { %v710_v62 = vmul.f32 %v708_v19, %v699_v20  ;;  %v720_v30 = vrot.slane %v617_v61, %v719_v1  ;;  %v724_v31 = vrot.slane %v618_v63, %v719_v1  ;;  %v736_v32 = vrot.slane %v617_v61, %v735_v2 }
 0x153   : >> { %v679_v28 = vadd.f32 %v677_v21, %v647_v13  ;;  %v680_v29 = vadd.f32 %v678_v23, %v648_v14  ;;  %v740_v33 = vrot.slane %v618_v63, %v735_v2 }
 0x154   : >> { %v751_v50 = vpop.permute.xlu0 %750 }
 0x155   : >> { %v711_v34 = vadd.f32 %v709_v27, %v679_v28  ;;  %v712_v35 = vadd.f32 %v710_v62, %v680_v29  ;;  %v683_v36 = vpop.permute.xlu1 %682 }
 0x156   : >> { %v693_v37 = vmul.f32 %v688_v22, %v683_v36  ;;  %v694_v38 = vmul.f32 %v692_v43, %v683_v36 }
 0x158   : >> { %v695_v40 = vadd.f32 %v693_v37, %v663_v24  ;;  %v696_v25 = vadd.f32 %v694_v38, %v664_v26 }
 0x15a   : >> { %v715_v42 = vpop.permute.xlu1 %714 }
 0x15b   : >> { %v725_v3 = vmul.f32 %v720_v30, %v715_v42  ;;  %v726_v44 = vmul.f32 %v724_v31, %v715_v42 }
 0x15d   : >> { %v727_v46 = vadd.f32 %v725_v3, %v695_v40  ;;  %v728_v47 = vadd.f32 %v726_v44, %v696_v25 }
 0x15f   : >> { %v731_v48 = vpop.permute.xlu1 %730 }
 0x160   : >> { %v741_v41 = vmul.f32 %v736_v32, %v731_v48  ;;  %v742_v39 = vmul.f32 %v740_v33, %v731_v48 }
 0x162   : >> { %v743_v45 = vadd.f32 %v741_v41, %v711_v34  ;;  %v744_v49 = vadd.f32 %v742_v39, %v712_v35 }
 0x164   : >> { %v745_v51 = vadd.f32 %v743_v45, %v727_v46  ;;  %v746_v52 = vadd.f32 %v744_v49, %v728_v47 }
 0x166   : >> { %v753_v54 = vadd.f32 %v751_v50, %v745_v51  ;;  %v754_v55 = vadd.f32 %v751_v50, %v746_v52 }
 0x167   : > { %389 = sbr.rel (!%p387_p5) target bundleno = 154 (0x9a), region = 121 }
 0x168   : >> { %vm755_vm12 = vcmp.ge.f32.partialorder %v753_v54, 0.0  ;;  %vm756_vm13 = vcmp.ge.f32.partialorder %v754_v55, 0.0  ;;  %v758_v56 = vmul.f32 %v757_v53, %v753_v54  ;;  %v759_v57 = vmul.f32 %v757_v53, %v754_v55 }
 0x16a   : >> { %v760_v58 = vsel %vm755_vm12, %v753_v54, %v758_v56  ;;  %v761_v59 = vsel %vm756_vm13, %v754_v55, %v759_v57 }
 0x16b   : >> { %v764_v60 = vcombine.low %v760_v58, %v761_v59 }
 0x16d   : >> { %768 = vst [vmem:[%s767_s2] sm:$0xff] %v764_v60  ;;  %s770_s2 = scalar_lea.sflag (%p387_p5), [#allocation5], %s1581_s20 }
 0x16e   : > { %1209 = shalt.err (!%p1206_p12)
}
 0x16f   : > { %s1210_s13 = scalar_lea.hbm %s784_s23, 640  ;;  %s1214_s21 = scalar_lea.hbm %s1844_s14, 2560 }
 0x170   : > { %p1211_p0 = scmp.ne.s32.totalorder %s784_s23, %s1210_s13  ;;  %p1215_p4 = scmp.lt.u32.totalorder %s784_s23, %s1844_s14 }
 0x171   : > { %p1216_p1 = scmp.lt.u32.totalorder %s1214_s21, %s1210_s13  ;;  %p1218_p7 = scmp.lt.u32.totalorder %s1210_s13, %s784_s23 }
 0x172   : > { %p1212_p3 = pnand %p1211_p0, %p1527_p9 }
 0x173   : > { %p1217_p5 = por %p1216_p1, %p1215_p4 }
 0x174   : > { %p1213_p8 = pneg %p1212_p3 }
 0x175   : > { %p1219_p10 = por %p1218_p7, %p1217_p5 }
 0x177   : > { %p1220_p11 = pnand %p1219_p10, %p1213_p8 }
 0x179   : > { %1223 = shalt.err (!%p1220_p11)
}
 0x17a   : > { %965 = dma.vmem_to_hbm [thread:$0]  (%p1527_p9), %s1742_s27, 640, %s784_s23, %s770_s2  }
 0x17b PF: > { %s1845_s8 = sld [smem:[#allocation16_spill]]  ;;  %s1846_s7 = sld [smem:[#allocation18_spill]] }
 0x17c   : > { %p992_p13 = scmp.ge.s32.totalorder %s1306_s12, 2 }
 0x181   : > { %s798_s1 = sand.u32 1, %s1845_s8   ;;  %p1847_p2 = scmp.ne.s32.totalorder %s1846_s7, 0 }
 0x182   : > { %s799_s9 = scalar_lea.sflag [#allocation5], %s798_s1 }
 0x183   : > { %p982_p6 = pnand %p992_p13, %p1847_p2 }
 0x185   : > { %1273 = dma.done.wait (!%p982_p6), %s799_s9, 640  }
 0x186   : > { %1275 = vsyncadd (!%p982_p6), %s799_s9, 4294966656  ;;  %s26_s12 = sadd.s32 1, %s1306_s12   ;;  %s1848_s18 = sld [smem:[#allocation19_spill]] }
 0x187   : > { %p23_p12 = scmp.ge.s32.totalorder %s26_s12, 6   ;;  %s1849_s15 = sld [smem:[#allocation20_spill]] }
 0x188   : > { %s1850_s27 = smov %s1282_s28  ;;  %s1851_s28 = smov %s1286_s29 }
 0x189   : > { %s1852_s29 = smov %s1544_s16  ;;  %s1853_s30 = smov %s1298_s10 }
 0x18a   : > { %s1854_s9 = smov %s1302_s11  ;;  %25 = sbr.rel (!%p23_p12) target bundleno = 14 (0xe), region = 132 }
 0x18c   : > { %s1855_s10 = smov %s1848_s18 }
 0x18d   : > { %s1856_s11 = smov %s1849_s15 }
 0x191   :  { %804 = vsyncpa [#allocation4], 1 }
 0x192   :  { %806 = vsyncpa [#allocation4 + $0x1], 1 }
 0x193   :  { %807 = vsyncpa [#allocation8], 1 }
 0x194   :  { %808 = vsyncpa [#allocation5], 1 }
 0x195   :  { %810 = vsyncpa [#allocation5 + $0x1], 1 }
 0x196   :  { %811 = vsyncpa [#allocation6], 1 }
 0x197   :  { %813 = vsyncpa [#allocation6 + $0x1], 1 }

</bundles_post_ra>
